<compile_context>
chip_gen: v7x
topology: tpu7x:2x2x1
jax: 0.10.0
libtpu: 0.0.40
codegen_flags: <defaults>
</compile_context>

<pallas_src>
import jax
import jax.numpy as jnp
from jax.experimental import pallas as pl
from jax.experimental.pallas import tpu as pltpu

# ---- problem constants (match the torch module) ----
IN_C, OUT_C = 1, 12
KH, KW = 11, 11
STRIDE = 5
H, W = 64, 64
OH = (H - KH) // STRIDE + 1        # 11
OW = (W - KW) // STRIDE + 1        # 11
M = OH * OW                        # 121 output positions
K = IN_C * KH * KW                 # 121 kernel taps
KP = 128                           # contraction dim padded to lane width (zeros -> exact)


def conv_gemm_kernel(w_ref, p_ref, b_ref, o_ref):
    # w_ref: (12, 128)   weights  [out_channel, tap]      (K zero-padded)
    # p_ref: (128, 121)  patches  [tap, position]         (K zero-padded)
    # b_ref: (12, 1)     bias per out_channel
    # o_ref: (12, 121)   output   [out_channel, position]
    acc = jnp.dot(w_ref[...], p_ref[...], preferred_element_type=jnp.float32)
    o_ref[...] = acc + b_ref[...]


@jax.jit
def conv2d_pallas(x, weight, bias):
    """x: (1, 1, 64, 64) f32, weight: (12, 1, 11, 11) f32, bias: (12,) f32
    -> (1, 12, 11, 11) f32, same semantics as torch.nn.Conv2d(1, 12, 11, stride=5)."""
    # im2col in one fused op: (1, K, OH, OW), tap index k = kh*KW + kw (k-major)
    patches = jax.lax.conv_general_dilated_patches(
        x, filter_shape=(KH, KW), window_strides=(STRIDE, STRIDE), padding="VALID",
    )
    p_t = patches.reshape(K, M)                       # (121, 121)
    w2 = weight.reshape(OUT_C, K)                     # (12, 121)

    # pad ONLY the contraction dim (exact, fully-aligned MXU contraction); these tiny
    # producers are allowed to fuse into the pallas_call operands (allow_input_fusion).
    p_pad = jnp.pad(p_t, ((0, KP - K), (0, 0)))       # (128, 121)
    w_pad = jnp.pad(w2, ((0, 0), (0, KP - K)))        # (12, 128)
    b2 = bias.reshape(OUT_C, 1)                       # (12, 1)

    out = pl.pallas_call(
        conv_gemm_kernel,
        out_shape=jax.ShapeDtypeStruct((OUT_C, M), jnp.float32),
        in_specs=[
            pl.BlockSpec((OUT_C, KP), lambda: (0, 0)),   # full-array blocks, no grid
            pl.BlockSpec((KP, M), lambda: (0, 0)),
            pl.BlockSpec((OUT_C, 1), lambda: (0, 0)),
        ],
        out_specs=pl.BlockSpec((OUT_C, M), lambda: (0, 0)),
        compiler_params=pltpu.CompilerParams(
            allow_input_fusion=[True, True, True],
        ),
        cost_estimate=pl.CostEstimate(
            flops=2 * OUT_C * K * M,
            bytes_accessed=4 * (K * M + OUT_C * K + OUT_C + OUT_C * M),
            transcendentals=0,
        ),
    )(w_pad, p_pad, b2)                               # (12, 121)

    # free reshape only -- no slice, no transpose
    return out.reshape(1, OUT_C, OH, OW)


def reference_conv(x, weight, bias):
    # pure-JAX reference (NCHW, OIHW) for a sanity check
    return jax.lax.conv_general_dilated(
        x, weight, window_strides=(STRIDE, STRIDE), padding="VALID",
        dimension_numbers=("NCHW", "OIHW", "NCHW"),
    ) + bias.reshape(1, OUT_C, 1, 1)


if __name__ == "__main__":
    key = jax.random.PRNGKey(0)
    kx, kw, kb = jax.random.split(key, 3)

    # deterministic parameter init (uniform ~ torch default fan-in bound)
    fan_in = IN_C * KH * KW
    bound = 1.0 / (fan_in ** 0.5)
    weight = jax.random.uniform(kw, (OUT_C, IN_C, KH, KW), jnp.float32, -bound, bound)
    bias = jax.random.uniform(kb, (OUT_C,), jnp.float32, -bound, bound)
    x1 = jax.random.normal(kx, (1, IN_C, H, W), jnp.float32)

    y = jax.block_until_ready(conv2d_pallas(x1, weight, bias))
    y_ref = reference_conv(x1, weight, bias)

    assert y.shape == (1, OUT_C, OH, OW)
    assert jnp.allclose(y, y_ref, atol=1e-4, rtol=1e-4)

    print("KERNEL_OK")
</pallas_src>

<mosaic_0001>
module attributes {stable_mosaic.version = 11 : i64} {
  func.func @conv_gemm_kernel(%arg0: memref<12x128xf32, #tpu.memory_space<vmem>>, %arg1: memref<128x121xf32, #tpu.memory_space<vmem>>, %arg2: memref<12x1xf32, #tpu.memory_space<vmem>>, %arg3: memref<12x121xf32, #tpu.memory_space<vmem>>) attributes {dimension_semantics = [], scalar_prefetch = 0 : i64, scratch_operands = 0 : i64, tpu.core_type = #tpu.core_type<tc>} {
    %c0 = arith.constant 0 : index
    %c0_0 = arith.constant 0 : index
    %0 = vector.load %arg0[%c0, %c0_0] : memref<12x128xf32, #tpu.memory_space<vmem>>, vector<12x128xf32>
    %c0_1 = arith.constant 0 : index
    %c0_2 = arith.constant 0 : index
    %1 = vector.load %arg1[%c0_1, %c0_2] : memref<128x121xf32, #tpu.memory_space<vmem>>, vector<128x121xf32>
    %cst = arith.constant dense<0.000000e+00> : vector<12x121xf32>
    %2 = tpu.matmul %0, %1, %cst {dimension_numbers = #tpu.dot_dimension_numbers<[1], [0], [0], [1], [0, 0, 1, 1], [], []>} : vector<12x128xf32>, vector<128x121xf32>, vector<12x121xf32> -> vector<12x121xf32>
    %c0_3 = arith.constant 0 : index
    %c0_4 = arith.constant 0 : index
    %3 = vector.load %arg2[%c0_3, %c0_4] : memref<12x1xf32, #tpu.memory_space<vmem>>, vector<12x1xf32>
    %4 = vector.broadcast %3 : vector<12x1xf32> to vector<12x121xf32>
    %5 = arith.addf %2, %4 : vector<12x121xf32>
    %c0_5 = arith.constant 0 : index
    %c0_6 = arith.constant 0 : index
    %6 = vector.load %arg3[%c0_5, %c0_6] : memref<12x121xf32, #tpu.memory_space<vmem>>, vector<12x121xf32>
    tpu.vector_store %arg3[%c0_5, %c0_6], %5 {strides = array<i32>} : memref<12x121xf32, #tpu.memory_space<vmem>>, vector<12x121xf32>,
    return
  }
}

</mosaic_0001>

<bundles_post_ra>
// kernel: conv2d_pallas.2
= control target key start
LH: loop header
LB: loop body
LE: loop exit
PB: predicated region body
PF: predicated region fallthrough
CT: control target
= control target key end

     0   :  { %s655_s0 = inlined_call_operand.vmem [shape: f32[12,1], index: 0, kind: input, shape index: {}]   ;;  %s656_s1 = inlined_call_operand.vmem [shape: f32[121,121], index: 1, kind: input, shape index: {}]   ;;  %s657_s2 = inlined_call_operand.<no memory space> [shape: f32[], index: 2, kind: input, shape index: {}]   ;;  %s658_s3 = inlined_call_operand.vmem [shape: f32[12,121], index: 3, kind: input, shape index: {}]   ;;  %s659_s4 = inlined_call_operand.vmem [shape: f32[12,121], index: 4, kind: output, shape index: {}]  }
   0x1   :  { %v528_v0 = vstv %s657_s2 }
   0x2   :  { %v23_v1 = vlaneseq  ;;  %v45_v2 = vld [vmem:[%s656_s1] sm:$0xff]  ;;  %v499_v3 = vmov 0   ;;  %v397_v5 = vld [vmem:[%s656_s1 + $0x8] sm:$0xff]  ;;  %v398_v6 = vld [vmem:[%s656_s1 + $0x10] sm:$0xff]  ;;  %vm390_vm3 = vcmask 986112   ;;  %vm388_vm4 = vcmask 990208  }
   0x3   :  { %498 = vset.pattern.permute.xlu0 %v499_v3  ;;  %v399_v7 = vld [vmem:[%s656_s1 + $0x18] sm:$0xff]  ;;  %v400_v9 = vld [vmem:[%s656_s1 + $0x20] sm:$0xff]  ;;  %v401_v10 = vld [vmem:[%s656_s1 + $0x28] sm:$0xff] }
   0x4   :  { %v533_v4 = vand.u32 127, %v23_v1  ;;  %v33_v8 = vshrl.u32 %v23_v1, 7  ;;  %v301_v18 = vld [vmem:[%s655_s0] sm:$0xff]  ;;  %v402_v21 = vld [vmem:[%s656_s1 + $0x30] sm:$0xff]  ;;  %v403_v22 = vld [vmem:[%s656_s1 + $0x38] sm:$0xff] }
   0x5   :  { %305 = vperm.xlu0 %498, %v301_v18   ;;  %v396_v23 = vld [vmem:[%s658_s3 + $0x8] sm:$0xff]  ;;  %v17_v24 = vld [vmem:[%s658_s3] sm:$0xff]  ;;  %v406_v37 = vld [vmem:[%s656_s1 + $0x50] sm:$0xff] }
   0x6   :  { %vm26_vm0 = vcmp.lt.s32.totalorder %v533_v4, 121  ;;  %v34_v17 = vadd.s32 8, %v33_v8  ;;  %v302_v25 = vld [vmem:[%s655_s0 + $0x8] sm:$0xf]  ;;  %v404_v31 = vld [vmem:[%s656_s1 + $0x40] sm:$0xff]  ;;  %v407_v38 = vld [vmem:[%s656_s1 + $0x58] sm:$0xff] }
   0x7   :  { %v55_v11 = vsel %vm26_vm0, %v45_v2, %v528_v0  ;;  %v69_v12 = vsel %vm26_vm0, %v397_v5, %v528_v0  ;;  %v84_v13 = vsel %vm26_vm0, %v398_v6, %v528_v0  ;;  %v99_v14 = vsel %vm26_vm0, %v399_v7, %v528_v0  ;;  %v405_v32 = vld [vmem:[%s656_s1 + $0x48] sm:$0xff]  ;;  %v408_v43 = vld [vmem:[%s656_s1 + $0x60] sm:$0xff]  ;;  %v411_v45 = vld [vmem:[%s656_s1 + $0x78] sm:$0xff] }
   0x8   :  { %v465_v15 = vpack.c.bf16 %v69_v12, %v55_v11  ;;  %v469_v16 = vpack.c.bf16 %v99_v14, %v84_v13  ;;  %v114_v19 = vsel %vm26_vm0, %v400_v9, %v528_v0  ;;  %v129_v20 = vsel %vm26_vm0, %v401_v10, %v528_v0  ;;  %v409_v44 = vld [vmem:[%s656_s1 + $0x68] sm:$0xff]  ;;  %v410_v49 = vld [vmem:[%s656_s1 + $0x70] sm:$0xff] }
   0x9   :  { %v473_v26 = vpack.c.bf16 %v129_v20, %v114_v19  ;;  %vm35_vm1 = vcmp.lt.s32.totalorder %v34_v17, 12  ;;  %v144_v27 = vsel %vm26_vm0, %v402_v21, %v528_v0  ;;  %v159_v28 = vsel %vm26_vm0, %v403_v22, %v528_v0  ;;  %310 = vperm.xlu0 %498, %v302_v25  }
   0xa   :  { %466 = vmatprep.subr.bf16.mxu0 %v465_v15  ;;  %v36_v29 = vsel %vm35_vm1, %v396_v23, %v528_v0  ;;  %v27_v30 = vsel %vm26_vm0, %v17_v24, %v528_v0  ;;  %v477_v34 = vpack.c.bf16 %v159_v28, %v144_v27  ;;  %v174_v35 = vsel %vm26_vm0, %v404_v31, %v528_v0 }
   0xb   :  { %468 = vmatpush3.bf16.msra.mxu0 %v465_v15  ;;  %v41_v33 = vsel %vm26_vm0, %v36_v29, %v528_v0  ;;  %462 = vmatprep.mubr.f32.mxu0 %v27_v30  ;;  %v189_v36 = vsel %vm26_vm0, %v405_v32, %v528_v0  ;;  %v272_v39 = vadd.s32 120, %v33_v8  ;;  %v204_v41 = vsel %vm26_vm0, %v406_v37, %v528_v0 }
   0xc   :  { %470 = vmatprep.subr.bf16.mxu0 %v469_v16  ;;  %44 = vst [vmem:[#allocation12 + $0x8] sm:$0xff] %v41_v33  ;;  %v481_v40 = vpack.c.bf16 %v189_v36, %v174_v35  ;;  %v219_v42 = vsel %vm26_vm0, %v407_v38, %v528_v0  ;;  %v234_v47 = vsel %vm26_vm0, %v408_v43, %v528_v0 }
   0xd   :  { %vm273_vm2 = vcmp.lt.s32.totalorder %v272_v39, 121  ;;  %v485_v46 = vpack.c.bf16 %v219_v42, %v204_v41  ;;  %v249_v48 = vsel %vm26_vm0, %v409_v44, %v528_v0  ;;  %v264_v52 = vsel %vm26_vm0, %v410_v49, %v528_v0 }
   0xe   :  { %v274_v50 = vsel %vm273_vm2, %v411_v45, %v528_v0  ;;  %v489_v51 = vpack.c.bf16 %v249_v48, %v234_v47 }
   0xf   :  { %472 = vmatpush3.bf16.msra.mxu0 %v469_v16  ;;  %v279_v53 = vsel %vm26_vm0, %v274_v50, %v528_v0 }
  0x10   :  { %474 = vmatprep.subr.bf16.mxu0 %v473_v26  ;;  %v493_v54 = vpack.c.bf16 %v279_v53, %v264_v52 }
  0x13   :  { %476 = vmatpush3.bf16.msra.mxu0 %v473_v26  ;;  %v284_v55 = vld [vmem:[#allocation12 + $0x8] sm:$0xf] }
  0x14   :  { %478 = vmatprep.subr.bf16.mxu0 %v477_v34 }
  0x17   :  { %480 = vmatpush3.bf16.msra.mxu0 %v477_v34 }
  0x18   :  { %482 = vmatprep.subr.bf16.mxu0 %v481_v40 }
  0x1b   :  { %484 = vmatpush3.bf16.msra.mxu0 %v481_v40 }
  0x1c   :  { %486 = vmatprep.subr.bf16.mxu0 %v485_v46 }
  0x1f   :  { %488 = vmatpush3.bf16.msra.mxu0 %v485_v46 }
  0x20   :  { %490 = vmatprep.subr.bf16.mxu0 %v489_v51 }
  0x23   :  { %492 = vmatpush3.bf16.msra.mxu0 %v489_v51 }
  0x24   :  { %494 = vmatprep.subr.bf16.mxu0 %v493_v54 }
  0x27   :  { %496 = vmatpush3.bf16.msra.mxu0 %v493_v54 }
  0x2a   :  { %463 = vmatmul.mubr.f32.vlgmr.msra.gmra.mrb[0].mxu0 %v284_v55 }
  0x84   :  { %v306_v56 = vpop.permute.xlu0 %305 }
  0x88   :  { %v311_v57 = vpop.permute.xlu0 %310 }
  0xfd   :  { %v464_v58 = vpop.f32.mrb[0].mxu0 }
  0xfe   :  { %v385_v59 = vadd.f32 %v464_v58, %v311_v57  ;;  %v379_v60 = vpop.f32.mrb[1].mxu0 }
  0xff   :  { %v380_v61 = vadd.f32 %v379_v60, %v306_v56 }
 0x100   :  { %391 = vst.msk [vmem:[%s659_s4 + $0x8] sm:$0xf] %vm390_vm3, %v385_v59 }
 0x101   :  { %389 = vst.msk [vmem:[%s659_s4] sm:$0xff] %vm388_vm4, %v380_v61 }

</bundles_post_ra>
